<compile_context>
chip_gen: v5e
topology: v5e:2x2
jax: 0.10.0
libtpu: 0.0.40
codegen_flags: <defaults>
</compile_context>

<pallas_src>
import jax
import jax.numpy as jnp
import numpy as np
from jax import lax
from jax.experimental import pallas as pl
from jax.experimental.pallas import tpu as pltpu

LANES = 128  # lane-dense minor dimension for FC weight / bias / output


def simplecnn_forward(x, conv_w, conv_b, fc_w, fc_b):
    """x: (N,1,H,W) NCHW; conv_w: (3,1,5,5); conv_b: (3,); fc_w: (10,108); fc_b: (10,)."""
    N, C, H, W = x.shape
    assert C == 1, "SimpleCNN.forward assumes 1-channel images"
    nf, cin, KH, KW = conv_w.shape
    assert cin == 1
    HO, WO = H - KH + 1, W - KW + 1          # valid conv output size (12, 12)
    HP, WP = HO // 2, WO // 2                # pooled size (6, 6)
    out_size = fc_w.shape[0]
    assert fc_w.shape[1] == nf * HP * WP

    CW = nf * WO          # lane-stacked conv width (36)
    FW = CW - 1           # width of a sparse pooled row (35)
    KWIDE = HP * FW       # FC contraction length after lane-concat of valid rows (210)
    PW = KH * W           # row-im2col width (5 * 16 = 80)

    # ---------------- wrapper-side layout plumbing (parameters only) ----------------
    x_stack = x.reshape(N, H, W).astype(jnp.float32)

    # Banded conv weight for the row-im2col matmul:
    #   wband[di*W + jp, ch*WO + j] = conv_w[ch, 0, di, jp - j]  when 0 <= jp - j < KW,
    # so that  (patches @ wband)[i, ch*WO + j] = sum_{di,dj} x[i+di, j+dj] * w[ch, di, dj].
    jp = np.arange(W)[:, None]                       # image column index
    jj = np.arange(WO)[None, :]                      # conv output column index
    dj = jp - jj
    valid = (dj >= 0) & (dj < KW)
    onehot = valid[:, :, None] & (np.clip(dj, 0, KW - 1)[:, :, None]
                                  == np.arange(KW)[None, None, :])
    sel = jnp.asarray(onehot.astype(np.float32))     # (W, WO, KW), static
    w_k = conv_w.reshape(nf, KH, KW).astype(jnp.float32)
    wband = jnp.einsum('pjd,cid->ipcj', sel, w_k).reshape(PW, CW)   # (80, 36)
    cb_row = jnp.repeat(conv_b.astype(jnp.float32), WO)[None, :]    # (1, nf*WO)

    # FC weight, lane-dense (KWIDE, 128).  Pooled value (ch, i, j) lands at sparse flat
    # position i*FW + ch*WO + 2j and must hit PyTorch-flatten column ch*HP*WP + i*WP + j.
    row_idx = np.empty((nf * HP * WP,), np.int32)
    for ch in range(nf):
        for i in range(HP):
            for j in range(WP):
                row_idx[ch * HP * WP + i * WP + j] = i * FW + ch * WO + 2 * j
    fcw_wide = (jnp.zeros((KWIDE, LANES), jnp.float32)
                   .at[row_idx, :out_size].set(fc_w.T.astype(jnp.float32)))
    fcb_pad = (jnp.zeros((1, LANES), jnp.float32)
                  .at[:, :out_size].set(fc_b.astype(jnp.float32)[None, :]))

    def kernel(x_ref, wband_ref, cb_ref, fcw_ref, fcb_ref, o_ref):
        xi = x_ref[0]                                                # (H, W)

        # Row-im2col: lane-concat the KH row-shifted (full-width) views -> (HO, KH*W).
        patches = jnp.concatenate([xi[di:di + HO, :] for di in range(KH)], axis=1)

        # Valid conv for all 3 channels as a single MXU matmul: (HO, PW) @ (PW, CW).
        conv_all = jnp.dot(patches, wband_ref[...],
                           preferred_element_type=jnp.float32) + cb_ref[...]

        # MaxPool2d(2) on the VPU: compare with the shifted-by-one neighbor.  The 2x2
        # maxima land at even (row, in-channel-col) positions; every other position holds
        # junk that the zero rows of fcw_wide cancel, so no compaction is needed.
        rmax = jnp.maximum(conv_all[:HO - 1, :], conv_all[1:HO, :])  # (HO-1, CW)
        pmax = jnp.maximum(rmax[:, :CW - 1], rmax[:, 1:CW])          # (HO-1, CW-1)
        act = jnp.maximum(pmax, 0.0)                                 # ReLU

        # Flatten: lane-concat the HP valid (even) rows -> (1, KWIDE).
        flat = jnp.concatenate([act[2 * i:2 * i + 1, :] for i in range(HP)], axis=1)

        # Linear layer: one MXU matmul against the lane-dense padded weight.
        logits = jnp.dot(flat, fcw_ref[...], preferred_element_type=jnp.float32)
        o_ref[...] = logits + fcb_ref[...]                           # (1, 128) dense store

    out_pad = pl.pallas_call(
        kernel,
        out_shape=jax.ShapeDtypeStruct((N, LANES), jnp.float32),
        grid=(N,),
        in_specs=[
            pl.BlockSpec((1, H, W), lambda b: (b, 0, 0)),            # image (per grid step)
            pl.BlockSpec((PW, CW), lambda b: (0, 0)),                # banded conv weight
            pl.BlockSpec((1, CW), lambda b: (0, 0)),                 # conv bias row
            pl.BlockSpec((KWIDE, LANES), lambda b: (0, 0)),          # lane-dense FC weight
            pl.BlockSpec((1, LANES), lambda b: (0, 0)),              # lane-dense FC bias
        ],
        out_specs=pl.BlockSpec((1, LANES), lambda b: (b, 0)),
        compiler_params=pltpu.CompilerParams(dimension_semantics=("parallel",)),
    )(x_stack, wband, cb_row, fcw_wide, fcb_pad)

    return out_pad[:, :out_size]


def reference_forward(x, conv_w, conv_b, fc_w, fc_b):
    """Plain-JAX reference mirroring the PyTorch forward (N == 1)."""
    y = lax.conv_general_dilated(
        x, conv_w, window_strides=(1, 1), padding="VALID",
        dimension_numbers=("NCHW", "OIHW", "NCHW"))
    y = y + conv_b[None, :, None, None]
    y = lax.reduce_window(y, -jnp.inf, lax.max,
                          window_dimensions=(1, 1, 2, 2),
                          window_strides=(1, 1, 2, 2), padding="VALID")
    y = jnp.maximum(y, 0.0)
    y = y.reshape(1, -1)
    return y @ fc_w.T + fc_b[None, :]


if __name__ == "__main__":
    img_w = img_h = 16
    nr_filters, ksize, pool, out_size = 3, 5, 2, 10
    fc_in = ((img_w - 2 * (ksize // 2)) * (img_h - 2 * (ksize // 2))
             * nr_filters // (2 * pool))                      # = 108 for 16x16

    # Deterministic parameter init (PyTorch-default-style uniform ranges).
    key = jax.random.PRNGKey(0)
    k1, k2, k3, k4, k5 = jax.random.split(key, 5)
    kc = 1.0 / np.sqrt(1 * ksize * ksize)
    kf = 1.0 / np.sqrt(fc_in)
    conv_w = jax.random.uniform(k1, (nr_filters, 1, ksize, ksize), jnp.float32, -kc, kc)
    conv_b = jax.random.uniform(k2, (nr_filters,), jnp.float32, -kc, kc)
    fc_w = jax.random.uniform(k3, (out_size, fc_in), jnp.float32, -kf, kf)
    fc_b = jax.random.uniform(k4, (out_size,), jnp.float32, -kf, kf)
    x = jax.random.normal(k5, (1, 1, img_h, img_w), jnp.float32)  # forward() implies N=1

    out = jax.block_until_ready(simplecnn_forward(x, conv_w, conv_b, fc_w, fc_b))
    ref = reference_forward(x, conv_w, conv_b, fc_w, fc_b)
    assert out.shape == (1, out_size)
    np.testing.assert_allclose(np.asarray(out), np.asarray(ref), rtol=1e-4, atol=1e-4)
    print("KERNEL_OK")
</pallas_src>

<mosaic_0001>
module attributes {stable_mosaic.version = 11 : i64} {
  func.func @kernel(%arg0: i32, %arg1: memref<1x16x16xf32, #tpu.memory_space<vmem>>, %arg2: memref<80x36xf32, #tpu.memory_space<vmem>>, %arg3: memref<1x36xf32, #tpu.memory_space<vmem>>, %arg4: memref<210x128xf32, #tpu.memory_space<vmem>>, %arg5: memref<1x128xf32, #tpu.memory_space<vmem>>, %arg6: memref<1x128xf32, #tpu.memory_space<vmem>>) attributes {dimension_semantics = [#tpu.dimension_semantics<parallel>], iteration_bounds = array<i64: 1>, scalar_prefetch = 0 : i64, scratch_operands = 0 : i64, tpu.core_type = #tpu.core_type<tc>, window_params = [{transform_indices = @transform_0, window_bounds = array<i64: 1, 16, 16>}, {pipeline_mode = #tpu.pipeline_mode<synchronous>, transform_indices = @transform_1, window_bounds = array<i64: 80, 36>}, {pipeline_mode = #tpu.pipeline_mode<synchronous>, transform_indices = @transform_2, window_bounds = array<i64: 1, 36>}, {pipeline_mode = #tpu.pipeline_mode<synchronous>, transform_indices = @transform_3, window_bounds = array<i64: 210, 128>}, {pipeline_mode = #tpu.pipeline_mode<synchronous>, transform_indices = @transform_4, window_bounds = array<i64: 1, 128>}, {transform_indices = @transform_5, window_bounds = array<i64: 1, 128>}]} {
    %c0 = arith.constant 0 : index
    %c0_0 = arith.constant 0 : index
    %c0_1 = arith.constant 0 : index
    %0 = vector.load %arg1[%c0, %c0_0, %c0_1] : memref<1x16x16xf32, #tpu.memory_space<vmem>>, vector<1x16x16xf32>
    %1 = vector.shape_cast %0 : vector<1x16x16xf32> to vector<16x16xf32>
    %2 = vector.extract_strided_slice %1 {offsets = [0, 0], sizes = [12, 16], strides = [1, 1]} : vector<16x16xf32> to vector<12x16xf32>
    %3 = vector.extract_strided_slice %1 {offsets = [1, 0], sizes = [12, 16], strides = [1, 1]} : vector<16x16xf32> to vector<12x16xf32>
    %4 = vector.extract_strided_slice %1 {offsets = [2, 0], sizes = [12, 16], strides = [1, 1]} : vector<16x16xf32> to vector<12x16xf32>
    %5 = vector.extract_strided_slice %1 {offsets = [3, 0], sizes = [12, 16], strides = [1, 1]} : vector<16x16xf32> to vector<12x16xf32>
    %6 = vector.extract_strided_slice %1 {offsets = [4, 0], sizes = [12, 16], strides = [1, 1]} : vector<16x16xf32> to vector<12x16xf32>
    %7 = tpu.concatenate %2, %3, %4, %5, %6 in 1 : vector<12x16xf32>, vector<12x16xf32>, vector<12x16xf32>, vector<12x16xf32>, vector<12x16xf32> -> vector<12x80xf32>
    %c0_2 = arith.constant 0 : index
    %c0_3 = arith.constant 0 : index
    %8 = vector.load %arg2[%c0_2, %c0_3] : memref<80x36xf32, #tpu.memory_space<vmem>>, vector<80x36xf32>
    %cst = arith.constant dense<0.000000e+00> : vector<12x36xf32>
    %9 = tpu.matmul %7, %8, %cst {dimension_numbers = #tpu.dot_dimension_numbers<[1], [0], [0], [1], [0, 0, 1, 1], [], []>} : vector<12x80xf32>, vector<80x36xf32>, vector<12x36xf32> -> vector<12x36xf32>
    %c0_4 = arith.constant 0 : index
    %c0_5 = arith.constant 0 : index
    %10 = vector.load %arg3[%c0_4, %c0_5] : memref<1x36xf32, #tpu.memory_space<vmem>>, vector<1x36xf32>
    %11 = vector.broadcast %10 : vector<1x36xf32> to vector<12x36xf32>
    %12 = arith.addf %9, %11 : vector<12x36xf32>
    %13 = vector.extract_strided_slice %12 {offsets = [0, 0], sizes = [11, 36], strides = [1, 1]} : vector<12x36xf32> to vector<11x36xf32>
    %14 = vector.extract_strided_slice %12 {offsets = [1, 0], sizes = [11, 36], strides = [1, 1]} : vector<12x36xf32> to vector<11x36xf32>
    %15 = arith.maximumf %13, %14 : vector<11x36xf32>
    %16 = vector.extract_strided_slice %15 {offsets = [0, 0], sizes = [11, 35], strides = [1, 1]} : vector<11x36xf32> to vector<11x35xf32>
    %17 = vector.extract_strided_slice %15 {offsets = [0, 1], sizes = [11, 35], strides = [1, 1]} : vector<11x36xf32> to vector<11x35xf32>
    %18 = arith.maximumf %16, %17 : vector<11x35xf32>
    %cst_6 = arith.constant 0.000000e+00 : f32
    %19 = vector.broadcast %cst_6 : f32 to vector<11x35xf32>
    %20 = arith.maximumf %18, %19 : vector<11x35xf32>
    %21 = vector.extract_strided_slice %20 {offsets = [0, 0], sizes = [1, 35], strides = [1, 1]} : vector<11x35xf32> to vector<1x35xf32>
    %22 = vector.extract_strided_slice %20 {offsets = [2, 0], sizes = [1, 35], strides = [1, 1]} : vector<11x35xf32> to vector<1x35xf32>
    %23 = vector.extract_strided_slice %20 {offsets = [4, 0], sizes = [1, 35], strides = [1, 1]} : vector<11x35xf32> to vector<1x35xf32>
    %24 = vector.extract_strided_slice %20 {offsets = [6, 0], sizes = [1, 35], strides = [1, 1]} : vector<11x35xf32> to vector<1x35xf32>
    %25 = vector.extract_strided_slice %20 {offsets = [8, 0], sizes = [1, 35], strides = [1, 1]} : vector<11x35xf32> to vector<1x35xf32>
    %26 = vector.extract_strided_slice %20 {offsets = [10, 0], sizes = [1, 35], strides = [1, 1]} : vector<11x35xf32> to vector<1x35xf32>
    %27 = tpu.concatenate %21, %22, %23, %24, %25, %26 in 1 : vector<1x35xf32>, vector<1x35xf32>, vector<1x35xf32>, vector<1x35xf32>, vector<1x35xf32>, vector<1x35xf32> -> vector<1x210xf32>
    %c0_7 = arith.constant 0 : index
    %c0_8 = arith.constant 0 : index
    %28 = vector.load %arg4[%c0_7, %c0_8] : memref<210x128xf32, #tpu.memory_space<vmem>>, vector<210x128xf32>
    %cst_9 = arith.constant dense<0.000000e+00> : vector<1x128xf32>
    %29 = tpu.matmul %27, %28, %cst_9 {dimension_numbers = #tpu.dot_dimension_numbers<[1], [0], [0], [1], [0, 0, 1, 1], [], []>} : vector<1x210xf32>, vector<210x128xf32>, vector<1x128xf32> -> vector<1x128xf32>
    %c0_10 = arith.constant 0 : index
    %c0_11 = arith.constant 0 : index
    %30 = vector.load %arg5[%c0_10, %c0_11] : memref<1x128xf32, #tpu.memory_space<vmem>>, vector<1x128xf32>
    %31 = arith.addf %29, %30 : vector<1x128xf32>
    %c0_12 = arith.constant 0 : index
    %c0_13 = arith.constant 0 : index
    %32 = vector.load %arg6[%c0_12, %c0_13] : memref<1x128xf32, #tpu.memory_space<vmem>>, vector<1x128xf32>
    tpu.vector_store %arg6[%c0_12, %c0_13], %31 {strides = array<i32>} : memref<1x128xf32, #tpu.memory_space<vmem>>, vector<1x128xf32>,
    return
  }
  func.func @transform_0(%arg0: i32) -> (i32, i32, i32) {
    %c0_i32 = arith.constant 0 : i32
    %c0_i32_0 = arith.constant 0 : i32
    %c0_i32_1 = arith.constant 0 : i32
    return %arg0, %c0_i32, %c0_i32_0 : i32, i32, i32
  }
  func.func @transform_1(%arg0: i32) -> (i32, i32) {
    %c0_i32 = arith.constant 0 : i32
    %c0_i32_0 = arith.constant 0 : i32
    %c0_i32_1 = arith.constant 0 : i32
    return %c0_i32, %c0_i32_0 : i32, i32
  }
  func.func @transform_2(%arg0: i32) -> (i32, i32) {
    %c0_i32 = arith.constant 0 : i32
    %c0_i32_0 = arith.constant 0 : i32
    %c0_i32_1 = arith.constant 0 : i32
    return %c0_i32, %c0_i32_0 : i32, i32
  }
  func.func @transform_3(%arg0: i32) -> (i32, i32) {
    %c0_i32 = arith.constant 0 : i32
    %c0_i32_0 = arith.constant 0 : i32
    %c0_i32_1 = arith.constant 0 : i32
    return %c0_i32, %c0_i32_0 : i32, i32
  }
  func.func @transform_4(%arg0: i32) -> (i32, i32) {
    %c0_i32 = arith.constant 0 : i32
    %c0_i32_0 = arith.constant 0 : i32
    %c0_i32_1 = arith.constant 0 : i32
    return %c0_i32, %c0_i32_0 : i32, i32
  }
  func.func @transform_5(%arg0: i32) -> (i32, i32) {
    %c0_i32 = arith.constant 0 : i32
    %c0_i32_0 = arith.constant 0 : i32
    return %arg0, %c0_i32 : i32, i32
  }
}

</mosaic_0001>

<bundles_post_ra>
// kernel: tpu_custom_call.1
= control target key start
LH: loop header
LB: loop body
LE: loop exit
PB: predicated region body
PF: predicated region fallthrough
CT: control target
= control target key end

     0   :  { %10 = vsyncpa [#allocation3], 0  ;;  %s461_s0 = inlined_call_operand.vmem [shape: f32[1,16,16], index: 0, kind: input, shape index: {}]   ;;  %s462_s1 = inlined_call_operand.vmem [shape: f32[80,36], index: 1, kind: input, shape index: {}]   ;;  %s463_s2 = inlined_call_operand.vmem [shape: f32[1,36], index: 2, kind: input, shape index: {}]   ;;  %s464_s3 = inlined_call_operand.hbm [shape: f32[210,128], index: 3, kind: input, shape index: {}]   ;;  %s465_s4 = inlined_call_operand.vmem [shape: f32[1,128], index: 4, kind: input, shape index: {}]   ;;  %s466_s5 = inlined_call_operand.hbm [shape: f32[1,128], index: 5, kind: output, shape index: {}]  }
   0x1   :  { %11 = vsyncpa [#allocation4], 0  ;;  %s22_s20 = sshll.u32 %s464_s3, 4  ;;  %s354_s21 = smov [#allocation2]   ;;  %s23_s20 = int_to_ptr.hbm [resolvable:$true] %s22_s20 }
   0x2   :  { %s24_s22 = sshll.u32 %s354_s21, 4  ;;  %s355_s23 = smov 128   ;;  %s25_s22 = int_to_ptr.vmem [resolvable:$true] %s24_s22 }
   0x3   :  { %s356_s24 = smov 8  }
   0x4   :  { %30 = dma.hbm_to_vmem [thread:$0]  %s23_s20, 3456, %s25_s22, [#allocation3], %s355_s23, %s355_s23, %s356_s24  }
   0x5   :  { %350 = dma.done.wait [#allocation3], 3456  }
   0x6   :  { %351 = vsyncadd [#allocation3], 4294963840  ;;  %v37_v0 = vld [vmem:[%s461_s0] sm:$0xff]  ;;  %v407_v1 = vld [vmem:[%s461_s0 + $0x8] sm:$0xff]  ;;  %vm41_vm0 = vcmask 1046528   ;;  %vm61_vm1 = vcmask 1044480  }
   0x7   :  { %v102_v2 = vld [vmem:[%s462_s1 + $0x48] sm:$0xff]  ;;  %v42_v3 = vrot.slane %v37_v0, 1  ;;  %v43_v4 = vrot.slane %v407_v1, 1  ;;  %v62_v5 = vrot.slane %v37_v0, 3  ;;  %v63_v6 = vrot.slane %v407_v1, 3  ;;  %v101_v7 = vld [vmem:[%s462_s1 + $0x40] sm:$0xff] }
   0x8   :  { %120 = vmatpush.msra.mxu0 %v102_v2  ;;  %v100_v8 = vld [vmem:[%s462_s1 + $0x38] sm:$0xff]  ;;  %s357_s8 = smov 16   ;;  %s358_s9 = smov 48   ;;  %v99_v11 = vld [vmem:[%s462_s1 + $0x30] sm:$0xff]  ;;  %v52_v12 = vrot.slane %v37_v0, 2  ;;  %v53_v13 = vrot.slane %v407_v1, 2 }
   0x9   :  { %v44_v9 = vsel %vm41_vm0, %v42_v3, %v43_v4  ;;  %v64_v10 = vsel %vm61_vm1, %v62_v5, %v63_v6  ;;  %47 = vrot.lane.b32.xlu2 %v43_v4, %s357_s8  ;;  %v72_v14 = vrot.slane %v37_v0, 4  ;;  %v73_v15 = vrot.slane %v407_v1, 4  ;;  %s359_s12 = smov 32   ;;  %s360_s13 = smov 64   ;;  %v98_v18 = vld [vmem:[%s462_s1 + $0x28] sm:$0xff]  ;;  %v97_v19 = vld [vmem:[%s462_s1 + $0x20] sm:$0xff] }
   0xa   :  { %121 = vmatpush.msra.mxu0 %v101_v7  ;;  %45 = vrot.lane.b32.xlu0 %v44_v9, %s357_s8  ;;  %vm51_vm2 = vcmask 1045504   ;;  %vm71_vm3 = vcmask 1043456   ;;  %v96_v20 = vld [vmem:[%s462_s1 + $0x18] sm:$0xff]  ;;  %v95_v21 = vld [vmem:[%s462_s1 + $0x10] sm:$0xff]  ;;  %v94_v22 = vld [vmem:[%s462_s1 + $0x8] sm:$0xff]  ;;  %vm81_vm4 = vcmask 130048  }
   0xb   :  { %65 = vrot.lane.b32.xlu1 %v64_v10, %s358_s9  ;;  %v54_v16 = vsel %vm51_vm2, %v52_v12, %v53_v13  ;;  %v74_v17 = vsel %vm71_vm3, %v72_v14, %v73_v15  ;;  %v93_v23 = vld [vmem:[%s462_s1] sm:$0xff]  ;;  %vm84_vm5 = vcmask 261120   ;;  %vm87_vm6 = vcmask 392192   ;;  %s361_s27 = smov 127   ;;  %v204_v53 = vld [vmem:[#allocation2 + $0x78] sm:$0xff]  ;;  %v203_v54 = vld [vmem:[#allocation2 + $0x70] sm:$0xff] }
   0xc   :  { %122 = vmatpush.msra.mxu0 %v100_v8  ;;  %vm90_vm7 = vcmask 523264   ;;  %vm107_vm8 = vcmask 654336   ;;  %v301_v41 = vld [vmem:[%s463_s2] ss:$0 sm:$0xff]  ;;  %225 = vmatpush.msra.mxu1 %v204_v53  ;;  %v202_v56 = vld [vmem:[#allocation2 + $0x68] sm:$0xff]  ;;  %s362_s2 = smov 105  }
   0xd   :  { %v201_v57 = vld [vmem:[#allocation2 + $0x60] sm:$0xff]  ;;  %v200_v58 = vld [vmem:[#allocation2 + $0x58] sm:$0xff]  ;;  %v199_v59 = vld [vmem:[#allocation2 + $0x50] sm:$0xff]  ;;  %s363_s28 = smov 35   ;;  %s364_s3 = smov 12   ;;  %vm221_vm9 = vcmask 1041408  }
   0xe   :  { %123 = vmatpush.msra.mxu0 %v99_v11  ;;  %226 = vmatpush.msra.mxu1 %v203_v54  ;;  %v198_v61 = vld [vmem:[#allocation2 + $0x48] sm:$0xff]  ;;  %v197_v62 = vld [vmem:[#allocation2 + $0x40] sm:$0xff]  ;;  %v196_v63 = vld [vmem:[#allocation2 + $0x38] sm:$0xff]  ;;  %s365_s29 = smov 47   ;;  %s366_s30 = smov 70   ;;  %vm179_vm10 = vcmask 285696  }
   0xf   :  { %v195_v5 = vld [vmem:[#allocation2 + $0x30] sm:$0xff]  ;;  %v193_v7 = vld [vmem:[#allocation2 + $0x20] sm:$0xff]  ;;  %v192_v9 = vld [vmem:[#allocation2 + $0x18] sm:$0xff]  ;;  %vm181_vm11 = vcmask 572416   ;;  %vm183_vm12 = vcmask 859136   ;;  %vm185_vm13 = vcmask 97280  }
  0x10   :  { %124 = vmatpush.msra.mxu0 %v98_v18  ;;  %227 = vmatpush.msra.mxu1 %v202_v56  ;;  %v215_v8 = vld [vmem:[#allocation2 + $0xd0] sm:$0x3]  ;;  %v214_v10 = vld [vmem:[#allocation2 + $0xc8] sm:$0xff]  ;;  %v213_v12 = vld [vmem:[#allocation2 + $0xc0] sm:$0xff]  ;;  %vm187_vm14 = vcmask 384000   ;;  %vm217_vm15 = vcmask 670720  }
  0x11   :  { %57 = vrot.lane.b32.xlu2 %v53_v13, %s359_s12  ;;  %285 = vmatpush.msk.msra.mxu2 %vm221_vm9, %v215_v8  ;;  %v191_v11 = vld [vmem:[#allocation2 + $0x10] sm:$0xff]  ;;  %v190_v13 = vld [vmem:[#allocation2 + $0x8] sm:$0xff]  ;;  %v212_v14 = vld [vmem:[#allocation2 + $0xb8] sm:$0xff]  ;;  %s367_s0 = smov [#allocation5]   ;;  %s273_s11 = sshll.u32 %s466_s5, 4  ;;  %s274_s11 = int_to_ptr.hbm [resolvable:$true] %s273_s11 }
  0x12   :  { %55 = vrot.lane.b32.xlu0 %v54_v16, %s359_s12  ;;  %125 = vmatpush.msra.mxu0 %v97_v19  ;;  %v211_v16 = vld [vmem:[#allocation2 + $0xb0] sm:$0xff]  ;;  %v209_v18 = vld [vmem:[#allocation2 + $0xa0] sm:$0xff]  ;;  %v208_v19 = vld [vmem:[#allocation2 + $0x98] sm:$0xff]  ;;  %s271_s8 = sshll.u32 %s367_s0, 4  ;;  %s272_s8 = int_to_ptr.vmem [resolvable:$true] %s271_s8 }
  0x13   :  { %75 = vrot.lane.b32.xlu1 %v74_v17, %s360_s13  ;;  %228 = vmatpush.msra.mxu1 %v201_v57  ;;  %v210_v17 = vld [vmem:[#allocation2 + $0xa8] sm:$0xff] }
  0x14   :  { %126 = vmatpush.msra.mxu0 %v96_v20  ;;  %251 = vmatpush.msra.mxu2 %v214_v10  ;;  %v207_v20 = vld [vmem:[#allocation2 + $0x90] sm:$0xff] }
  0x15   :  { %229 = vmatpush.msra.mxu1 %v200_v58 }
  0x16   :  { %127 = vmatpush.msra.mxu0 %v95_v21  ;;  %252 = vmatpush.msra.mxu2 %v213_v12  ;;  %v206_v21 = vld [vmem:[#allocation2 + $0x88] sm:$0xff] }
  0x17   :  { %230 = vmatpush.msra.mxu1 %v199_v59 }
  0x18   :  { %128 = vmatpush.msra.mxu0 %v94_v22  ;;  %253 = vmatpush.msra.mxu2 %v212_v14  ;;  %v205_v22 = vld [vmem:[#allocation2 + $0x80] sm:$0xff] }
  0x19   :  { %231 = vmatpush.msra.mxu1 %v198_v61 }
  0x1a   :  { %67 = vrot.lane.b32.xlu0 %v63_v6, %s358_s9  ;;  %129 = vmatpush.msra.mxu0 %v93_v23  ;;  %v194_v6 = vld [vmem:[#allocation2 + $0x28] sm:$0xff] }
  0x1b   :  { %77 = vrot.lane.b32.xlu1 %v73_v15, %s360_s13  ;;  %232 = vmatpush.msra.mxu1 %v197_v62  ;;  %v189_v15 = vld [vmem:[#allocation2] sm:$0xff] }
  0x1c   :  { %254 = vmatpush.msra.mxu2 %v211_v16 }
  0x1d   :  { %233 = vmatpush.msra.mxu1 %v196_v63 }
  0x1e   :  { %255 = vmatpush.msra.mxu2 %v210_v17 }
  0x1f   :  { %234 = vmatpush.msra.mxu1 %v195_v5 }
  0x20   :  { %256 = vmatpush.msra.mxu2 %v209_v18 }
  0x21   :  { %235 = vmatpush.msra.mxu1 %v194_v6 }
  0x22   :  { %257 = vmatpush.msra.mxu2 %v208_v19 }
  0x23   :  { %236 = vmatpush.msra.mxu1 %v193_v7 }
  0x24   :  { %258 = vmatpush.msra.mxu2 %v207_v20 }
  0x25   :  { %237 = vmatpush.msra.mxu1 %v192_v9 }
  0x26   :  { %259 = vmatpush.msra.mxu2 %v206_v21 }
  0x27   :  { %238 = vmatpush.msra.mxu1 %v191_v11 }
  0x28   :  { %260 = vmatpush.msra.mxu2 %v205_v22 }
  0x29   :  { %239 = vmatpush.msra.mxu1 %v190_v13 }
  0x2b   :  { %240 = vmatpush.msra.mxu1 %v189_v15 }
  0x63   :  { %v48_v26 = vpop.permute.xlu2 %47 }
  0x64   :  { %v83_v33 = vsel %vm81_vm4, %v407_v1, %v48_v26 }
  0x6b   :  { %v58_v34 = vpop.permute.xlu2 %57 }
  0x6c   :  { %v86_v35 = vsel %vm84_vm5, %v83_v33, %v58_v34  ;;  %v216_v33 = vld [vmem:[%s465_s4] sm:$0x1] }
  0x7c   :  { %v46_v24 = vpop.permute.xlu0 %45 }
  0x7d   :  { %v66_v25 = vpop.permute.xlu1 %65  ;;  %v82_v27 = vsel %vm81_vm4, %v37_v0, %v46_v24 }
  0x84   :  { %v56_v28 = vpop.permute.xlu0 %55 }
  0x85   :  { %v76_v29 = vpop.permute.xlu1 %75  ;;  %v85_v30 = vsel %vm84_vm5, %v82_v27, %v56_v28 }
  0x86   :  { %v88_v31 = vsel %vm87_vm6, %v85_v30, %v66_v25 }
  0x87   :  { %v91_v32 = vsel %vm90_vm7, %v88_v31, %v76_v29 }
  0x88   :  { %283 = vmatmul.msk.f32.vlgmr.msra.gmra.mxu0 %vm107_vm8, %v91_v32 }
  0x8c   :  { %v68_v36 = vpop.permute.xlu0 %67 }
  0x8d   :  { %v78_v37 = vpop.permute.xlu1 %77  ;;  %v89_v38 = vsel %vm87_vm6, %v86_v35, %v68_v36 }
  0x8e   :  { %v92_v39 = vsel %vm90_vm7, %v89_v38, %v78_v37 }
  0x90   :  { %284 = vmatmul.msk.f32.gmra.mxu0 %vm107_vm8, %v92_v39 }
 0x105   :  { %v131_v40 = vpop.f32.mrf.mxu0 }
 0x106   :  { %v132_v42 = vadd.f32 %v301_v41, %v131_v40 }
 0x108   :  { %v139_v45 = vrot.slane %v132_v42, 1 }
 0x10d   :  { %v134_v43 = vpop.f32.mrf.mxu0 }
 0x10e   :  { %v135_v44 = vadd.f32 %v301_v41, %v134_v43 }
 0x110   :  { %v140_v46 = vrot.slane %v135_v44, 1 }
 0x112   :  { %v145_v47 = vmax.f32 %v135_v44, %v140_v46  ;;  %v141_v48 = vsel %vm41_vm0, %v139_v45, %v140_v46 }
 0x113   :  { %v144_v49 = vmax.f32 %v132_v42, %v141_v48 }
 0x114   :  { %150 = vrot.lane.b32.xlu0 %v145_v47, %s361_s27 }
 0x115   :  { %148 = vrot.lane.b32.xlu2 %v144_v49, %s361_s27 }
 0x16f   :  { %v149_v50 = vpop.permute.xlu2 %148 }
 0x170   :  { %v154_v51 = vmax.f32 %v144_v49, %v149_v50 }
 0x172   :  { %v449_v52 = vmax.f32 %v154_v51, 0.0 }
 0x174   :  { %v167_v55 = vrot.slane %v449_v52, 6  ;;  %v159_v60 = vrot.slane %v449_v52, 2  ;;  %v163_v4 = vrot.slane %v449_v52, 4 }
 0x176   :  { %168 = vrot.lane.b32.xlu1 %v167_v55, %s362_s2 }
 0x17e   :  { %160 = vrot.lane.b32.xlu1 %v159_v60, %s363_s28 }
 0x186   :  { %v151_v0 = vpop.permute.xlu0 %150 }
 0x187   :  { %v155_v1 = vmax.f32 %v145_v47, %v151_v0 }
 0x189   :  { %v157_v2 = vmax.f32 %v155_v1, 0.0 }
 0x18b   :  { %v175_v3 = vrot.slane %v157_v2, 2  ;;  %172 = vrot.lane.b32.xlu2 %v157_v2, %s364_s3 }
 0x18d   :  { %176 = vrot.lane.b32.xlu0 %v175_v3, %s365_s29 }
 0x193   :  { %164 = vrot.lane.b32.xlu2 %v163_v4, %s366_s30 }
 0x1e5   :  { %v173_v23 = vpop.permute.xlu2 %172 }
 0x1e8   :  { %v169_v24 = vpop.permute.xlu1 %168 }
 0x1e9   :  { %v186_v30 = vsel %vm185_vm13, %v169_v24, %v173_v23 }
 0x1ed   :  { %v165_v26 = vpop.permute.xlu2 %164 }
 0x1f0   :  { %v161_v25 = vpop.permute.xlu1 %160 }
 0x1f1   :  { %v180_v27 = vsel %vm179_vm10, %v449_v52, %v161_v25 }
 0x1f2   :  { %v182_v28 = vsel %vm181_vm11, %v180_v27, %v165_v26 }
 0x1f3   :  { %v184_v29 = vsel %vm183_vm12, %v182_v28, %v169_v24 }
 0x1f4   :  { %241 = vmatmul.f32.vlgmr.msra.gmra.mxu1 %v184_v29 }
 0x1ff   :  { %v177_v31 = vpop.permute.xlu0 %176 }
 0x200   :  { %v188_v32 = vsel %vm187_vm14, %v186_v30, %v177_v31 }
 0x201   :  { %286 = vmatmul.msk.f32.vlgmr.msra.gmra.mxu2 %vm217_vm15, %v188_v32 }
 0x271   :  { %v242_v34 = vpop.f32.mrf.mxu1 }
 0x272   :  { %v243_v35 = vadd.f32 %v242_v34, %v216_v33 }
 0x284   :  { %v262_v36 = vpop.f32.mrf.mxu2 }
 0x285   :  { %v263_v37 = vadd.f32 %v262_v36, %v243_v35 }
 0x287   :  { %265 = vst [vmem:[#allocation5] sm:$0x1] %v263_v37 }
 0x288   :  { %276 = dma.vmem_to_hbm [thread:$0]  %s272_s8, 16, %s274_s11, [#allocation4]  }
 0x289   :  { %352 = dma.done.wait [#allocation4], 16  }
 0x28a   :  { %353 = vsyncadd [#allocation4], 4294967280 }
 0x28b   :  { %281 = vsyncpa [#allocation3], 1 }
 0x28c   :  { %282 = vsyncpa [#allocation4], 1 }

</bundles_post_ra>
